<compile_context>
chip_gen: v7x
topology: tpu7x:2x2x1
jax: 0.10.0
libtpu: 0.0.40
codegen_flags: <defaults>
</compile_context>

<pallas_src>
import jax
import jax.numpy as jnp
from jax.experimental import pallas as pl
from jax.experimental.pallas import tpu as pltpu

EPS = 1e-5
LANE = 128
SUBLANE = 16          # bf16 output tile => second-minor block dim kept a multiple of 16
H3_PAD = 128          # layer-3 hidden width padded 64 -> 128 (lane-dense)


def mlp_kernel(x_ref,
               w1_ref, b1_ref,
               w2_ref, b2_ref,
               w3_ref, b3_ref,
               wo_ref, bo_ref,
               out_ref):
    # in-kernel bf16 cast (VPU slot; avoids a separate wrapper pass over x in HBM)
    x = x_ref[...].astype(jnp.bfloat16)

    # layer_1 (BN folded) -> relu
    h = jnp.dot(x, w1_ref[...], preferred_element_type=jnp.float32) + b1_ref[...]
    h = jnp.maximum(h, 0.0).astype(jnp.bfloat16)

    # layer_2 (BN folded) -> relu -> dropout (identity in eval)
    h = jnp.dot(h, w2_ref[...], preferred_element_type=jnp.float32) + b2_ref[...]
    h = jnp.maximum(h, 0.0).astype(jnp.bfloat16)

    # layer_3 (BN folded, width padded 64->128 with zeros) -> relu -> dropout (identity in eval)
    h = jnp.dot(h, w3_ref[...], preferred_element_type=jnp.float32) + b3_ref[...]
    h = jnp.maximum(h, 0.0).astype(jnp.bfloat16)

    # layer_out (classes padded to 128 lanes; padded columns are exact zeros, sliced off outside)
    out = jnp.dot(h, wo_ref[...], preferred_element_type=jnp.float32) + bo_ref[...]
    out_ref[...] = out.astype(out_ref.dtype)     # bf16 writeback (halves the dominant HBM stream)


def fold_bn(w, b, g, be, m, v):
    """Fold eval-mode BatchNorm1d into the preceding Linear layer."""
    scale = g * jax.lax.rsqrt(v + EPS)           # (1, out)
    return w * scale, (b - m) * scale + be       # W', b'


def _round_up(n, k):
    return ((n + k - 1) // k) * k


def _pick_batch_tile(B, block_batch=None, desired=4096):
    """Batch tile: large for DMA/overhead amortization, but always >= 2 grid steps (v7x megacore)."""
    if block_batch is not None:
        assert block_batch % SUBLANE == 0, "block_batch must be a multiple of 16"
        return block_batch
    half = _round_up(pl.cdiv(B, 2), SUBLANE)     # <= half the batch -> at least 2 grid steps
    return max(SUBLANE, min(desired, half))


def multiclass_classification_forward(x, params, *, block_batch=None):
    """Run the MLP forward pass as a single Pallas kernel, tiled over the batch dim."""
    B, F = x.shape
    C = params["wo"].shape[1]

    # ---- Constant-fold BN into the linear weights (trace-time, once). ----
    w1, b1 = fold_bn(params["w1"], params["b1"], params["g1"], params["be1"],
                     params["m1"], params["v1"])
    w2, b2 = fold_bn(params["w2"], params["b2"], params["g2"], params["be2"],
                     params["m2"], params["v2"])
    w3, b3 = fold_bn(params["w3"], params["b3"], params["g3"], params["be3"],
                     params["m3"], params["v3"])

    # ---- Lane-dense padding: layer-3 hidden 64 -> 128, classes C -> 128. ----
    Cp = _round_up(max(C, LANE), LANE)
    w3_p = jnp.zeros((w3.shape[0], H3_PAD), jnp.float32).at[:, :w3.shape[1]].set(w3)
    b3_p = jnp.zeros((1, H3_PAD), jnp.float32).at[:, :b3.shape[1]].set(b3)
    wo_p = jnp.zeros((H3_PAD, Cp), jnp.float32).at[:params["wo"].shape[0], :C].set(params["wo"])
    bo_p = jnp.zeros((1, Cp), jnp.float32).at[:, :C].set(params["bo"])

    # ---- bf16 MXU weight operands; biases stay f32. x stays f32 (cast in-kernel). ----
    w1b, w2b, w3b, wob = (w.astype(jnp.bfloat16) for w in (w1, w2, w3_p, wo_p))
    ordered = [w1b, b1, w2b, b2, w3b, b3_p, wob, bo_p]

    # ---- Batch tiling: ragged tail handled by Pallas (no wrapper pad copy). ----
    tb = _pick_batch_tile(B, block_batch)
    grid = (pl.cdiv(B, tb),)

    x_spec = pl.BlockSpec((tb, F), lambda i: (i, 0))

    def full_spec(arr):
        # constant-index block: loaded once, stays resident across the batch grid
        return pl.BlockSpec(arr.shape, lambda i: (0,) * arr.ndim)

    flops = 2 * B * (F * 512 + 512 * 128 + 128 * H3_PAD + H3_PAD * Cp)
    bytes_accessed = (x.size * x.dtype.itemsize
                      + B * Cp * 2
                      + sum(int(a.size) * a.dtype.itemsize for a in ordered))

    out = pl.pallas_call(
        mlp_kernel,
        out_shape=jax.ShapeDtypeStruct((B, Cp), jnp.bfloat16),
        grid_spec=pl.GridSpec(
            grid=grid,
            in_specs=[x_spec] + [full_spec(a) for a in ordered],
            out_specs=pl.BlockSpec((tb, Cp), lambda i: (i, 0)),
        ),
        compiler_params=pltpu.CompilerParams(
            dimension_semantics=("parallel",),
            vmem_limit_bytes=48 * 1024 * 1024,   # > v5e's 16 MiB default, < v7x's 64 MiB/TC
        ),
        cost_estimate=pl.CostEstimate(flops=flops, transcendentals=0,
                                      bytes_accessed=bytes_accessed),
    )(x, *ordered)

    return out[:, :C]


def init_params(key, num_feature, num_class):
    """Deterministic parameter init mimicking the shapes of the PyTorch module."""
    dims = [(num_feature, 512), (512, 128), (128, 64), (64, num_class)]
    names = ["1", "2", "3", "o"]
    params = {}
    for (fan_in, fan_out), name in zip(dims, names):
        key, kw, kb = jax.random.split(key, 3)
        bound = 1.0 / jnp.sqrt(jnp.float32(fan_in))
        # stored as (in, out) so the kernel computes h @ W
        params["w" + name] = jax.random.uniform(
            kw, (fan_in, fan_out), jnp.float32, minval=-bound, maxval=bound)
        params["b" + name] = jax.random.uniform(
            kb, (1, fan_out), jnp.float32, minval=-bound, maxval=bound)
    # BatchNorm params (gamma, beta, running_mean, running_var) for the three BN layers
    for feat, name in zip([512, 128, 64], ["1", "2", "3"]):
        key, kg, kbeta, km, kv = jax.random.split(key, 5)
        params["g" + name] = jax.random.uniform(kg, (1, feat), jnp.float32, minval=0.5, maxval=1.5)
        params["be" + name] = jax.random.uniform(kbeta, (1, feat), jnp.float32, minval=-0.1, maxval=0.1)
        params["m" + name] = jax.random.uniform(km, (1, feat), jnp.float32, minval=-0.2, maxval=0.2)
        params["v" + name] = jax.random.uniform(kv, (1, feat), jnp.float32, minval=0.5, maxval=1.5)
    return params


def reference_forward_f32(x, p):
    """Pure-JAX f32 reference with explicit eval-mode BatchNorm."""
    def bn(h, g, be, m, v):
        return (h - m) / jnp.sqrt(v + EPS) * g + be
    h = x @ p["w1"] + p["b1"]
    h = jnp.maximum(bn(h, p["g1"], p["be1"], p["m1"], p["v1"]), 0.0)
    h = h @ p["w2"] + p["b2"]
    h = jnp.maximum(bn(h, p["g2"], p["be2"], p["m2"], p["v2"]), 0.0)
    h = h @ p["w3"] + p["b3"]
    h = jnp.maximum(bn(h, p["g3"], p["be3"], p["m3"], p["v3"]), 0.0)
    return h @ p["wo"] + p["bo"]


def reference_forward_folded_bf16(x, p):
    """Pure-JAX reference matching the kernel math (BN folded, bf16 operands, f32 acc)."""
    w1, b1 = fold_bn(p["w1"], p["b1"], p["g1"], p["be1"], p["m1"], p["v1"])
    w2, b2 = fold_bn(p["w2"], p["b2"], p["g2"], p["be2"], p["m2"], p["v2"])
    w3, b3 = fold_bn(p["w3"], p["b3"], p["g3"], p["be3"], p["m3"], p["v3"])
    h = x.astype(jnp.bfloat16)
    h = jnp.dot(h, w1.astype(jnp.bfloat16), preferred_element_type=jnp.float32) + b1
    h = jnp.maximum(h, 0.0).astype(jnp.bfloat16)
    h = jnp.dot(h, w2.astype(jnp.bfloat16), preferred_element_type=jnp.float32) + b2
    h = jnp.maximum(h, 0.0).astype(jnp.bfloat16)
    h = jnp.dot(h, w3.astype(jnp.bfloat16), preferred_element_type=jnp.float32) + b3
    h = jnp.maximum(h, 0.0).astype(jnp.bfloat16)
    return jnp.dot(h, p["wo"].astype(jnp.bfloat16), preferred_element_type=jnp.float32) + p["bo"]


if __name__ == "__main__":
    num_feature, num_class = 16, 4
    batch = 50           # deliberately not a multiple of the tile -> exercises the ragged tail

    key = jax.random.PRNGKey(0)
    key, kx = jax.random.split(key)
    x = jax.random.normal(kx, (batch, num_feature), jnp.float32)
    params = init_params(key, num_feature, num_class)

    out = multiclass_classification_forward(x, params)     # default tile: >=2 grid steps
    out = jax.block_until_ready(out)
    assert out.shape == (batch, num_class)
    assert out.dtype == jnp.bfloat16
    out_f32 = out.astype(jnp.float32)

    # Check vs a pure-JAX reference using the same (folded, bf16-operand) math.
    # The only extra difference is the kernel's bf16 output rounding (~0.4% relative).
    ref_matched = reference_forward_folded_bf16(x, params)
    assert jnp.allclose(out_f32, ref_matched, atol=2e-2, rtol=2e-2), \
        "mismatch vs matched-precision ref"

    # Sanity check vs the full-f32 BatchNorm reference (bf16 weights/logits -> loose tolerance).
    ref_f32 = reference_forward_f32(x, params)
    assert jnp.allclose(out_f32, ref_f32, atol=1e-1, rtol=1e-1), "mismatch vs f32 BN reference"

    print("KERNEL_OK")
</pallas_src>

<mosaic_0001>
module attributes {stable_mosaic.version = 11 : i64} {
  func.func @mlp_kernel(%arg0: i32, %arg1: memref<32x16xf32, #tpu.memory_space<vmem>>, %arg2: memref<16x512xbf16, #tpu.memory_space<vmem>>, %arg3: memref<1x512xf32, #tpu.memory_space<vmem>>, %arg4: memref<512x128xbf16, #tpu.memory_space<vmem>>, %arg5: memref<1x128xf32, #tpu.memory_space<vmem>>, %arg6: memref<128x128xbf16, #tpu.memory_space<vmem>>, %arg7: memref<1x128xf32, #tpu.memory_space<vmem>>, %arg8: memref<128x128xbf16, #tpu.memory_space<vmem>>, %arg9: memref<1x128xf32, #tpu.memory_space<vmem>>, %arg10: memref<32x128xbf16, #tpu.memory_space<vmem>>) attributes {dimension_semantics = [#tpu.dimension_semantics<parallel>], iteration_bounds = array<i64: 2>, scalar_prefetch = 0 : i64, scratch_operands = 0 : i64, tpu.core_type = #tpu.core_type<tc>, window_params = [{transform_indices = @transform_0, window_bounds = array<i64: 32, 16>}, {pipeline_mode = #tpu.pipeline_mode<synchronous>, transform_indices = @transform_1, window_bounds = array<i64: 16, 512>}, {pipeline_mode = #tpu.pipeline_mode<synchronous>, transform_indices = @transform_2, window_bounds = array<i64: 1, 512>}, {pipeline_mode = #tpu.pipeline_mode<synchronous>, transform_indices = @transform_3, window_bounds = array<i64: 512, 128>}, {pipeline_mode = #tpu.pipeline_mode<synchronous>, transform_indices = @transform_4, window_bounds = array<i64: 1, 128>}, {pipeline_mode = #tpu.pipeline_mode<synchronous>, transform_indices = @transform_5, window_bounds = array<i64: 128, 128>}, {pipeline_mode = #tpu.pipeline_mode<synchronous>, transform_indices = @transform_6, window_bounds = array<i64: 1, 128>}, {pipeline_mode = #tpu.pipeline_mode<synchronous>, transform_indices = @transform_7, window_bounds = array<i64: 128, 128>}, {pipeline_mode = #tpu.pipeline_mode<synchronous>, transform_indices = @transform_8, window_bounds = array<i64: 1, 128>}, {transform_indices = @transform_9, window_bounds = array<i64: 32, 128>}]} {
    %c0 = arith.constant 0 : index
    %c0_0 = arith.constant 0 : index
    %0 = vector.load %arg1[%c0, %c0_0] : memref<32x16xf32, #tpu.memory_space<vmem>>, vector<32x16xf32>
    %1 = arith.truncf %0 : vector<32x16xf32> to vector<32x16xbf16>
    %c0_1 = arith.constant 0 : index
    %c0_2 = arith.constant 0 : index
    %2 = vector.load %arg2[%c0_1, %c0_2] : memref<16x512xbf16, #tpu.memory_space<vmem>>, vector<16x512xbf16>
    %cst = arith.constant dense<0.000000e+00> : vector<32x512xf32>
    %3 = tpu.matmul %1, %2, %cst {dimension_numbers = #tpu.dot_dimension_numbers<[1], [0], [0], [1], [0, 0, 1, 1], [], []>} : vector<32x16xbf16>, vector<16x512xbf16>, vector<32x512xf32> -> vector<32x512xf32>
    %c0_3 = arith.constant 0 : index
    %c0_4 = arith.constant 0 : index
    %4 = vector.load %arg3[%c0_3, %c0_4] : memref<1x512xf32, #tpu.memory_space<vmem>>, vector<1x512xf32>
    %5 = vector.broadcast %4 : vector<1x512xf32> to vector<32x512xf32>
    %6 = arith.addf %3, %5 : vector<32x512xf32>
    %cst_5 = arith.constant 0.000000e+00 : f32
    %7 = vector.broadcast %cst_5 : f32 to vector<32x512xf32>
    %8 = arith.maximumf %6, %7 : vector<32x512xf32>
    %9 = arith.truncf %8 : vector<32x512xf32> to vector<32x512xbf16>
    %c0_6 = arith.constant 0 : index
    %c0_7 = arith.constant 0 : index
    %10 = vector.load %arg4[%c0_6, %c0_7] : memref<512x128xbf16, #tpu.memory_space<vmem>>, vector<512x128xbf16>
    %cst_8 = arith.constant dense<0.000000e+00> : vector<32x128xf32>
    %11 = tpu.matmul %9, %10, %cst_8 {dimension_numbers = #tpu.dot_dimension_numbers<[1], [0], [0], [1], [0, 0, 1, 1], [], []>} : vector<32x512xbf16>, vector<512x128xbf16>, vector<32x128xf32> -> vector<32x128xf32>
    %c0_9 = arith.constant 0 : index
    %c0_10 = arith.constant 0 : index
    %12 = vector.load %arg5[%c0_9, %c0_10] : memref<1x128xf32, #tpu.memory_space<vmem>>, vector<1x128xf32>
    %13 = vector.broadcast %12 : vector<1x128xf32> to vector<32x128xf32>
    %14 = arith.addf %11, %13 : vector<32x128xf32>
    %cst_11 = arith.constant 0.000000e+00 : f32
    %15 = vector.broadcast %cst_11 : f32 to vector<32x128xf32>
    %16 = arith.maximumf %14, %15 : vector<32x128xf32>
    %17 = arith.truncf %16 : vector<32x128xf32> to vector<32x128xbf16>
    %c0_12 = arith.constant 0 : index
    %c0_13 = arith.constant 0 : index
    %18 = vector.load %arg6[%c0_12, %c0_13] : memref<128x128xbf16, #tpu.memory_space<vmem>>, vector<128x128xbf16>
    %cst_14 = arith.constant dense<0.000000e+00> : vector<32x128xf32>
    %19 = tpu.matmul %17, %18, %cst_14 {dimension_numbers = #tpu.dot_dimension_numbers<[1], [0], [0], [1], [0, 0, 1, 1], [], []>} : vector<32x128xbf16>, vector<128x128xbf16>, vector<32x128xf32> -> vector<32x128xf32>
    %c0_15 = arith.constant 0 : index
    %c0_16 = arith.constant 0 : index
    %20 = vector.load %arg7[%c0_15, %c0_16] : memref<1x128xf32, #tpu.memory_space<vmem>>, vector<1x128xf32>
    %21 = vector.broadcast %20 : vector<1x128xf32> to vector<32x128xf32>
    %22 = arith.addf %19, %21 : vector<32x128xf32>
    %cst_17 = arith.constant 0.000000e+00 : f32
    %23 = vector.broadcast %cst_17 : f32 to vector<32x128xf32>
    %24 = arith.maximumf %22, %23 : vector<32x128xf32>
    %25 = arith.truncf %24 : vector<32x128xf32> to vector<32x128xbf16>
    %c0_18 = arith.constant 0 : index
    %c0_19 = arith.constant 0 : index
    %26 = vector.load %arg8[%c0_18, %c0_19] : memref<128x128xbf16, #tpu.memory_space<vmem>>, vector<128x128xbf16>
    %cst_20 = arith.constant dense<0.000000e+00> : vector<32x128xf32>
    %27 = tpu.matmul %25, %26, %cst_20 {dimension_numbers = #tpu.dot_dimension_numbers<[1], [0], [0], [1], [0, 0, 1, 1], [], []>} : vector<32x128xbf16>, vector<128x128xbf16>, vector<32x128xf32> -> vector<32x128xf32>
    %c0_21 = arith.constant 0 : index
    %c0_22 = arith.constant 0 : index
    %28 = vector.load %arg9[%c0_21, %c0_22] : memref<1x128xf32, #tpu.memory_space<vmem>>, vector<1x128xf32>
    %29 = vector.broadcast %28 : vector<1x128xf32> to vector<32x128xf32>
    %30 = arith.addf %27, %29 : vector<32x128xf32>
    %31 = arith.truncf %30 : vector<32x128xf32> to vector<32x128xbf16>
    %c0_23 = arith.constant 0 : index
    %c0_24 = arith.constant 0 : index
    %32 = vector.load %arg10[%c0_23, %c0_24] : memref<32x128xbf16, #tpu.memory_space<vmem>>, vector<32x128xbf16>
    tpu.vector_store %arg10[%c0_23, %c0_24], %31 {strides = array<i32>} : memref<32x128xbf16, #tpu.memory_space<vmem>>, vector<32x128xbf16>,
    return
  }
  func.func @transform_0(%arg0: i32) -> (i32, i32) {
    %c0_i32 = arith.constant 0 : i32
    %c0_i32_0 = arith.constant 0 : i32
    return %arg0, %c0_i32 : i32, i32
  }
  func.func @transform_1(%arg0: i32) -> (i32, i32) {
    %c0_i32 = arith.constant 0 : i32
    %c0_i32_0 = arith.constant 0 : i32
    %c0_i32_1 = arith.constant 0 : i32
    return %c0_i32, %c0_i32_0 : i32, i32
  }
  func.func @transform_2(%arg0: i32) -> (i32, i32) {
    %c0_i32 = arith.constant 0 : i32
    %c0_i32_0 = arith.constant 0 : i32
    %c0_i32_1 = arith.constant 0 : i32
    return %c0_i32, %c0_i32_0 : i32, i32
  }
  func.func @transform_3(%arg0: i32) -> (i32, i32) {
    %c0_i32 = arith.constant 0 : i32
    %c0_i32_0 = arith.constant 0 : i32
    %c0_i32_1 = arith.constant 0 : i32
    return %c0_i32, %c0_i32_0 : i32, i32
  }
  func.func @transform_4(%arg0: i32) -> (i32, i32) {
    %c0_i32 = arith.constant 0 : i32
    %c0_i32_0 = arith.constant 0 : i32
    %c0_i32_1 = arith.constant 0 : i32
    return %c0_i32, %c0_i32_0 : i32, i32
  }
  func.func @transform_5(%arg0: i32) -> (i32, i32) {
    %c0_i32 = arith.constant 0 : i32
    %c0_i32_0 = arith.constant 0 : i32
    %c0_i32_1 = arith.constant 0 : i32
    return %c0_i32, %c0_i32_0 : i32, i32
  }
  func.func @transform_6(%arg0: i32) -> (i32, i32) {
    %c0_i32 = arith.constant 0 : i32
    %c0_i32_0 = arith.constant 0 : i32
    %c0_i32_1 = arith.constant 0 : i32
    return %c0_i32, %c0_i32_0 : i32, i32
  }
  func.func @transform_7(%arg0: i32) -> (i32, i32) {
    %c0_i32 = arith.constant 0 : i32
    %c0_i32_0 = arith.constant 0 : i32
    %c0_i32_1 = arith.constant 0 : i32
    return %c0_i32, %c0_i32_0 : i32, i32
  }
  func.func @transform_8(%arg0: i32) -> (i32, i32) {
    %c0_i32 = arith.constant 0 : i32
    %c0_i32_0 = arith.constant 0 : i32
    %c0_i32_1 = arith.constant 0 : i32
    return %c0_i32, %c0_i32_0 : i32, i32
  }
  func.func @transform_9(%arg0: i32) -> (i32, i32) {
    %c0_i32 = arith.constant 0 : i32
    %c0_i32_0 = arith.constant 0 : i32
    return %arg0, %c0_i32 : i32, i32
  }
}

</mosaic_0001>

<bundles_post_ra>
// kernel: tpu_custom_call.1
= control target key start
LH: loop header
LB: loop body
LE: loop exit
PB: predicated region body
PF: predicated region fallthrough
CT: control target
= control target key end

     0   :  { %s2159_s0 = inlined_call_operand.vmem [shape: f32[50,16], index: 0, kind: input, shape index: {}]   ;;  %s2160_s1 = inlined_call_operand.hbm [shape: bf16[16,512], index: 1, kind: input, shape index: {}]   ;;  %s2161_s2 = inlined_call_operand.vmem [shape: f32[1,512], index: 2, kind: input, shape index: {}]   ;;  %s2162_s3 = inlined_call_operand.hbm [shape: bf16[512,128], index: 3, kind: input, shape index: {}]   ;;  %s2163_s4 = inlined_call_operand.vmem [shape: f32[1,128], index: 4, kind: input, shape index: {}]   ;;  %s2164_s5 = inlined_call_operand.vmem [shape: bf16[128,128], index: 5, kind: input, shape index: {}]   ;;  %s2165_s6 = inlined_call_operand.vmem [shape: f32[1,128], index: 6, kind: input, shape index: {}]   ;;  %s2166_s7 = inlined_call_operand.hbm [shape: bf16[128,128], index: 7, kind: input, shape index: {}]   ;;  %s2167_s8 = inlined_call_operand.vmem [shape: f32[1,128], index: 8, kind: input, shape index: {}]   ;;  %s2168_s9 = inlined_call_operand.hbm [shape: bf16[50,128], index: 9, kind: output, shape index: {}]  }
   0x1   :  { %2177 = sst [smem:[#allocation16_spill]] %s2162_s3 }
   0x2   :  { %14 = vsyncpa [#allocation3], 0 }
   0x3   :  { %15 = vsyncpa [#allocation6], 0 }
   0x4   :  { %16 = vsyncpa [#allocation4], 0 }
   0x5   :  { %18 = vsyncpa [#allocation4 + $0x1], 0  ;;  %s1902_s30 = smov 0   ;;  %s1904_s10 = smov 0  }
   0x6   :  { %s1906_s11 = smov 0   ;;  %s1908_s12 = smov 0  }
   0x7 LB: > { %2178 = sst [smem:[#allocation12_spill]] %s1835_s11  ;;  %s1923_s13 = sadd.s32 4294967295, %s1839_s12   ;;  %s1839_s12 = sphi %s1908_s12, %s2198_s12   ;;  %s1835_s11 = sphi %s1906_s11, %s2200_s11   ;;  %s1831_s10 = sphi %s1904_s10, %s2202_s10   ;;  %s1827_s30 = sphi %s1902_s30, %s2201_s30  }
   0x8   : > { %s1338_s14 = sadd.s32 4294967294, %s1839_s12   ;;  %s1927_s15 = sadd.s32 1, %s1839_s12  }
   0x9   : > { %2179 = sst [smem:[#allocation13_spill]] %s1927_s15  ;;  %s225_s16 = sadd.s32 1, %s1835_s11 }
   0xa   : > { %s222_s17 = ssub.s32 %s1839_s12, %s1927_s15  ;;  %p235_p0 = scmp.ne.s32.totalorder %s1835_s11, %s1831_s10 }
   0xb   : > { %p223_p1 = scmp.eq.s32.totalorder %s222_s17, 0  ;;  %p236_p2 = scmp.eq.s32.totalorder %s1923_s13, 1 }
   0xc   : > { %p241_p3 = scmp.ne.s32.totalorder %s1831_s10, %s1827_s30  ;;  %p242_p4 = scmp.eq.s32.totalorder %s1338_s14, 1 }
   0xd   : > { %s1938_s18 = scalar_select %p223_p1, %s1835_s11, %s225_s16  }
   0xe   : > { %p1940_p5 = por %p236_p2, %p235_p0  ;;  %p1944_p6 = por %p242_p4, %p241_p3 }
   0xf   : > { %2180 = sst [smem:[#allocation14_spill]] %s1938_s18  ;;  %p1339_p7 = scmp.ge.s32.totalorder %s1839_s12, 1 }
  0x10   : > { %s2181_s19 = scalar_select %p1940_p5, 1, 0 }
  0x11   : > { %s2182_s20 = scalar_select %p1944_p6, 1, 0 }
  0x12   : > { %p249_p8 = scmp.lt.s32.totalorder %s1839_s12, 3  ;;  %p2169_p9 = scmp.eq.s32.totalorder %s1923_s13, 0 }
  0x13   : > { %2183 = sst [smem:[#allocation15_spill]] %s2182_s20  ;;  %s1841_s22 = smov [#allocation5]  }
  0x14   : > { %p1951_p10 = pnand %p1339_p7, %p249_p8  ;;  %s277_s23 = sshll.u32 %s1841_s22, 4  ;;  %s278_s23 = int_to_ptr.vmem [resolvable:$true] %s277_s23 }
  0x15   : > { %s1842_s25 = smov [#allocation2]   ;;  %s2186_s3 = sld [smem:[#allocation16_spill]] }
  0x16   : > { %s2184_s21 = scalar_select %p1951_p10, 1, 0 }
  0x17   : > { %p1568_p11 = pneg %p1951_p10  ;;  %s261_s26 = sshll.u32 %s1842_s25, 4  ;;  %s1963_s26 = int_to_ptr.vmem [resolvable:$true] %s261_s26 }
  0x19   : > { %p1959_p12 = pnand %p2169_p9, %p1568_p11 }
  0x1b   : > { %s1685_s29 = scalar_lea.hbm %s2186_s3, 4096  ;;  %p1973_p0 = pneg %p1959_p12 }
  0x1c   : > { %p1686_p13 = scmp.ne.s32.totalorder %s2186_s3, %s1685_s29  ;;  %p1692_p3 = scmp.lt.u32.totalorder %s1685_s29, %s2186_s3 }
  0x1e   : > { %p1688_p1 = pnand %p1973_p0, %p1686_p13 }
  0x20   : > { %p1689_p2 = pneg %p1688_p1 }
  0x22   : > { %p1694_p4 = pnand %p1692_p3, %p1689_p2 }
  0x24   : > { %1697 = shalt.err (!%p1694_p4)
}
  0x25   : > { %s1698_s27 = scalar_lea.vmem %s278_s23, 4096  ;;  %p1706_p9 = scmp.lt.s32.totalorder %s278_s23, %s278_s23 }
  0x26   : > { %p1699_p7 = scmp.ne.s32.totalorder %s278_s23, %s1698_s27  ;;  %p1707_p6 = scmp.lt.s32.totalorder %s1698_s27, %s1698_s27 }
  0x28   : > { %p1701_p8 = pnand %p1699_p7, %p1973_p0  ;;  %p1708_p5 = por %p1707_p6, %p1706_p9 }
  0x2a   : > { %p1702_p11 = pneg %p1701_p8 }
  0x2c   : > { %p1709_p10 = pnand %p1708_p5, %p1702_p11 }
  0x2e   : > { %1712 = shalt.err (!%p1709_p10)
}
  0x2f   : > { %s2175_s28 = smov 64   ;;  %s2176_s14 = smov 4  }
  0x30   : > { %1574 = dma.hbm_to_vmem [thread:$0]  (!%p1959_p12), %s2186_s3, 4096, %s278_s23, [#allocation6], %s2175_s28, %s2175_s28, %s2176_s14  }
  0x31   : > { %s1713_s18 = scalar_lea.hbm %s2160_s1, 512 }
  0x32   : > { %p1714_p5 = scmp.ne.s32.totalorder %s2160_s1, %s1713_s18  ;;  %p1720_p10 = scmp.lt.u32.totalorder %s1713_s18, %s2160_s1 }
  0x34   : > { %p1716_p6 = pnand %p1714_p5, %p1973_p0 }
  0x36   : > { %p1717_p9 = pneg %p1716_p6 }
  0x38   : > { %p1722_p13 = pnand %p1720_p10, %p1717_p9 }
  0x3a   : > { %1725 = shalt.err (!%p1722_p13)
}
  0x3b   : > { %s1726_s23 = scalar_lea.vmem %s1963_s26, 512  ;;  %p1734_p4 = scmp.lt.s32.totalorder %s1963_s26, %s1963_s26 }
  0x3c   : > { %p1727_p1 = scmp.ne.s32.totalorder %s1963_s26, %s1726_s23  ;;  %p1735_p7 = scmp.lt.s32.totalorder %s1726_s23, %s1726_s23 }
  0x3e   : > { %p1729_p2 = pnand %p1727_p1, %p1973_p0  ;;  %p1736_p8 = por %p1735_p7, %p1734_p4 }
  0x40   : > { %p1730_p3 = pneg %p1729_p2 }
  0x42   : > { %p1737_p11 = pnand %p1736_p8, %p1730_p3 }
  0x44   : > { %1740 = shalt.err (!%p1737_p11)
}
  0x45   : > { %s1845_s11 = smov 256   ;;  %s1846_s15 = smov 16  }
  0x46   : > { %1571 = dma.hbm_to_vmem [thread:$0]  (!%p1959_p12), %s2160_s1, 512, %s1963_s26, [#allocation3], %s1845_s11, %s1845_s11, %s1846_s15  }
  0x47   : > { %s1847_s29 = smov [#allocation7]   ;;  %s1741_s27 = scalar_lea.hbm %s2166_s7, 1024 }
  0x48   : > { %s299_s16 = sshll.u32 %s1847_s29, 4  ;;  %p1742_p5 = scmp.ne.s32.totalorder %s2166_s7, %s1741_s27  ;;  %s300_s16 = int_to_ptr.vmem [resolvable:$true] %s299_s16 }
  0x49   : > { %p1748_p10 = scmp.lt.u32.totalorder %s1741_s27, %s2166_s7 }
  0x4a   : > { %p1744_p6 = pnand %p1742_p5, %p1973_p0 }
  0x4c   : > { %p1745_p9 = pneg %p1744_p6 }
  0x4e   : > { %p1750_p13 = pnand %p1748_p10, %p1745_p9 }
  0x50   : > { %1753 = shalt.err (!%p1750_p13)
}
  0x51   : > { %s1754_s26 = scalar_lea.vmem %s300_s16, 1024  ;;  %p1762_p4 = scmp.lt.s32.totalorder %s300_s16, %s300_s16 }
  0x52   : > { %p1755_p1 = scmp.ne.s32.totalorder %s300_s16, %s1754_s26  ;;  %p1763_p7 = scmp.lt.s32.totalorder %s1754_s26, %s1754_s26 }
  0x54   : > { %p1757_p2 = pnand %p1755_p1, %p1973_p0  ;;  %p1764_p8 = por %p1763_p7, %p1762_p4 }
  0x56   : > { %p1758_p3 = pneg %p1757_p2 }
  0x58   : > { %p1765_p11 = pnand %p1764_p8, %p1758_p3 }
  0x5a   : > { %1768 = shalt.err (!%p1765_p11)
}
  0x5b   : > { %s2188_s28 = smov 4   ;;  %s2189_s11 = smov 64  }
  0x5c   : > { %1577 = dma.hbm_to_vmem [thread:$0]  (!%p1959_p12), %s2166_s7, 1024, %s300_s16, [#allocation6], %s2189_s11, %s2189_s11, %s2188_s28  }
  0x5d   : > { %p2190_p5 = scmp.ne.s32.totalorder %s2184_s21, 0 }
  0x5e   : > { %p2191_p0 = scmp.eq.s32.totalorder (!%p2190_p5), %s1923_s13, 0 }
  0x5f   : > { %335 = sbr.rel (%p2190_p5) target bundleno = 1041 (0x411), region = 56 }
  0x66   : > { %1814 = dma.done.wait (%p2191_p0), [#allocation3], 512   ;;  %p2192_p6 = pmov %p2191_p0 }
  0x67   : > { %p2193_p9 = pmov %p2191_p0 }
  0x68   : > { %1816 = vsyncadd (%p2192_p6), [#allocation3], 4294966784 }
  0x69   : > { %1818 = dma.done.wait (%p2193_p9), [#allocation6], 5120   ;;  %p2194_p10 = pmov %p2191_p0 }
  0x6a   : > { %s2047_s24 = sshll.u32 %s1923_s13, 2  ;;  %v1848_v0 = vmov 0   ;;  %v1631_v1 = vld [vmem:[#allocation2 + $0x4] ss:$16 sps:$4 sm:$0xff]   ;;  %v1633_v2 = vld [vmem:[#allocation2 + $0xc] ss:$16 sps:$4 sm:$0xff]   ;;  %v415_v44 = vlaneseq }
  0x6b   : > { %1820 = vsyncadd (%p2194_p10), [#allocation6], 4294962176  ;;  %494 = vmatprep.mubr.bf16.mxu0 %v1848_v0  ;;  %547 = vmatprep.mubr.bf16.mxu1 %v1848_v0  ;;  %p388_p12 = scmp.lt.s32.totalorder %s2047_s24, 6  ;;  %v1635_v3 = vld [vmem:[#allocation2] ss:$16 sps:$4 sm:$0xff]   ;;  %vm455_vm0 = vcmask 130048  }
  0x6c   : > { %462 = vmatprep.subr.bf16.mxu0 %v1631_v1  ;;  %v1636_v4 = vld [vmem:[#allocation2 + $0x8] ss:$16 sps:$4 sm:$0xff]   ;;  %515 = vmatprep.subr.bf16.mxu1 %v1633_v2  ;;  %v1637_v8 = vld [vmem:[#allocation5 + $0x40] sm:$0xff]   ;;  %v1645_v19 = vld [vmem:[#allocation5 + $0x50] sm:$0xff]   ;;  %v416_v45 = vshrl.u32 %v415_v44, 7  ;;  %s380_s26 = sand.u32 1, %s1831_s10  }
  0x6d   : > { %s389_s21 = scalar_select %p388_p12, %s2047_s24, 6  ;;  %463 = vmatpush1.bf16.msra.mxu0 %v1635_v3  ;;  %516 = vmatpush1.bf16.msra.mxu1 %v1636_v4  ;;  %v1638_v9 = vld [vmem:[#allocation5 + $0xc0] sm:$0xff]   ;;  %v1641_v14 = vld [vmem:[#allocation5 + $0x48] sm:$0xff]   ;;  %v1646_v20 = vld [vmem:[#allocation5 + $0xd0] sm:$0xff]  }
  0x6e   : > { %1439 = vmatprep.subr.bf16.mxu0 %v1637_v8  ;;  %v1639_v12 = vld [vmem:[#allocation5] sm:$0xff]   ;;  %1467 = vmatprep.subr.bf16.mxu1 %v1638_v9  ;;  %v1642_v15 = vld [vmem:[#allocation5 + $0xc8] sm:$0xff]   ;;  %v1647_v21 = vld [vmem:[#allocation5 + $0x10] sm:$0xff]   ;;  %v417_v46 = vsub.s32 0, %v416_v45  ;;  %v425_v47 = vsub.s32 2, %v416_v45  ;;  %v421_v49 = vsub.s32 1, %v416_v45 }
  0x6f   : > { %s1350_s17 = sshll.u32 %s389_s21, 3  ;;  %v1640_v13 = vld [vmem:[#allocation5 + $0x80] sm:$0xff]   ;;  %v1643_v16 = vld [vmem:[#allocation5 + $0x8] sm:$0xff]   ;;  %v1648_v22 = vld [vmem:[#allocation5 + $0x90] sm:$0xff]   ;;  %v429_v50 = vsub.s32 3, %v416_v45  ;;  %s1348_s3 = sshll.u32 %s380_s26, 4 }
  0x70   : > { %s391_s20 = scalar_lea.vmem %s2159_s0, %s1350_s17  ;;  %v1644_v18 = vld [vmem:[#allocation5 + $0x88] sm:$0xff]   ;;  %v1649_v23 = vld [vmem:[#allocation5 + $0x58] sm:$0xff]   ;;  %v1653_v27 = vld [vmem:[#allocation5 + $0x60] sm:$0xff]   ;;  %s382_s14 = scalar_lea.vmem [#allocation8], %s1348_s3 }
  0x71   : > { %v403_v5 = vld [vmem:[%s391_s20] sm:$0xff]  ;;  %v404_v6 = vld [vmem:[%s391_s20 + $0x8] sm:$0xff]  ;;  %v405_v10 = vld [vmem:[%s391_s20 + $0x10] sm:$0xff]  ;;  %s2099_s21 = scalar_lea.sflag [#allocation4], %s380_s26  ;;  %p2195_p13 = scmp.ne.s32.totalorder %s2181_s19, 0 }
  0x72   : > { %v407_v7 = vpack.c.bf16 %v404_v6, %v403_v5  ;;  %v406_v11 = vld [vmem:[%s391_s20 + $0x18] sm:$0xff]  ;;  %v1650_v24 = vld [vmem:[#allocation5 + $0xd8] sm:$0xff]   ;;  %v1657_v31 = vld [vmem:[#allocation5 + $0x68] sm:$0xff]   ;;  %s1234_s17 = ssub.s32 (%p2195_p13), 7, %s2047_s24 }
  0x73   : > { %v408_v17 = vpack.c.bf16 %v406_v11, %v405_v10  ;;  %v1651_v25 = vld [vmem:[#allocation5 + $0x18] sm:$0xff]   ;;  %v1654_v28 = vld [vmem:[#allocation5 + $0xe0] sm:$0xff]   ;;  %v1658_v32 = vld [vmem:[#allocation5 + $0xe8] sm:$0xff]   ;;  %p1235_p1 = scmp.lt.s32.totalorder (%p2195_p13), %s1234_s17, 4 }
  0x74   : > { %1355 = vmatmul.mubr.msk.bf16.vlgmr.msra.gmra.mrb[0].mxu0 %vm455_vm0, %v407_v7  ;;  %1357 = vmatmul.mubr.msk.bf16.vlgmr.msra.gmra.mrb[0].mxu1 %vm455_vm0, %v407_v7  ;;  %v1652_v26 = vld [vmem:[#allocation5 + $0x98] sm:$0xff]   ;;  %v1655_v29 = vld [vmem:[#allocation5 + $0x20] sm:$0xff]   ;;  %v1659_v33 = vld [vmem:[#allocation5 + $0x28] sm:$0xff]  }
  0x75   : > { %504 = vmatprep.mubr.bf16.mxu0 %v1848_v0  ;;  %557 = vmatprep.mubr.bf16.mxu1 %v1848_v0  ;;  %v1656_v30 = vld [vmem:[#allocation5 + $0xa0] sm:$0xff]   ;;  %v1660_v34 = vld [vmem:[#allocation5 + $0xa8] sm:$0xff]   ;;  %v1661_v35 = vld [vmem:[#allocation5 + $0x70] sm:$0xff]  }
  0x76   : > { %1440 = vmatpush3.bf16.msra.mxu0 %v1639_v12  ;;  %1468 = vmatpush3.bf16.msra.mxu1 %v1640_v13  ;;  %v1662_v36 = vld [vmem:[#allocation5 + $0xf0] sm:$0xff]   ;;  %v1665_v39 = vld [vmem:[#allocation5 + $0x78] sm:$0xff]   ;;  %v2061_v43 = vld [vmem:[%s2164_s5] sm:$0xff]  }
  0x77   : > { %1441 = vmatprep.subr.bf16.mxu0 %v1641_v14  ;;  %1469 = vmatprep.subr.bf16.mxu1 %v1642_v15  ;;  %v1663_v37 = vld [vmem:[#allocation5 + $0x30] sm:$0xff]   ;;  %v1666_v40 = vld [vmem:[#allocation5 + $0xf8] sm:$0xff]   ;;  %v413_v48 = vld [vmem:[%s2161_s2] sm:$0xf] }
  0x78   : > { %v1664_v38 = vld [vmem:[#allocation5 + $0xb0] sm:$0xff]   ;;  %v1667_v41 = vld [vmem:[#allocation5 + $0x38] sm:$0xff]   ;;  %v418_v51 = vrot.slane %v413_v48, %v417_v46  ;;  %v426_v52 = vrot.slane %v413_v48, %v425_v47  ;;  %v422_v53 = vrot.slane %v413_v48, %v421_v49  ;;  %v430_v54 = vrot.slane %v413_v48, %v429_v50  ;;  %v1673_v50 = vld [vmem:[%s2164_s5 + $0x20] sm:$0xff]  }
  0x79   : > { %v1668_v42 = vld [vmem:[#allocation5 + $0xb8] sm:$0xff]  }
  0x7a   : > { %1442 = vmatpush3.bf16.msra.mxu0 %v1643_v16  ;;  %1470 = vmatpush3.bf16.msra.mxu1 %v1644_v18 }
  0x7b   : > { %1443 = vmatprep.subr.bf16.mxu0 %v1645_v19  ;;  %1471 = vmatprep.subr.bf16.mxu1 %v1646_v20 }
  0x7c   : > { %1356 = vmatmul.mubr.msk.bf16.gmra.mrb[4].mxu0 %vm455_vm0, %v408_v17  ;;  %1358 = vmatmul.mubr.msk.bf16.gmra.mrb[4].mxu1 %vm455_vm0, %v408_v17 }
  0x7e   : > { %1444 = vmatpush3.bf16.msra.mxu0 %v1647_v21  ;;  %1472 = vmatpush3.bf16.msra.mxu1 %v1648_v22 }
  0x7f   : > { %1445 = vmatprep.subr.bf16.mxu0 %v1649_v23  ;;  %1473 = vmatprep.subr.bf16.mxu1 %v1650_v24 }
  0x82   : > { %1446 = vmatpush3.bf16.msra.mxu0 %v1651_v25  ;;  %1474 = vmatpush3.bf16.msra.mxu1 %v1652_v26  ;;  %v1670_v25 = vld [vmem:[%s2164_s5 + $0x8] sm:$0xff]  }
  0x83   : > { %1447 = vmatprep.subr.bf16.mxu0 %v1653_v27  ;;  %1475 = vmatprep.subr.bf16.mxu1 %v1654_v28 }
  0x86   : > { %1448 = vmatpush3.bf16.msra.mxu0 %v1655_v29  ;;  %1476 = vmatpush3.bf16.msra.mxu1 %v1656_v30 }
  0x87   : > { %1449 = vmatprep.subr.bf16.mxu0 %v1657_v31  ;;  %1477 = vmatprep.subr.bf16.mxu1 %v1658_v32 }
  0x8a   : > { %1450 = vmatpush3.bf16.msra.mxu0 %v1659_v33  ;;  %1478 = vmatpush3.bf16.msra.mxu1 %v1660_v34 }
  0x8b   : > { %1451 = vmatprep.subr.bf16.mxu0 %v1661_v35  ;;  %1479 = vmatprep.subr.bf16.mxu1 %v1662_v36 }
  0x8e   : > { %1452 = vmatpush3.bf16.msra.mxu0 %v1663_v37  ;;  %1480 = vmatpush3.bf16.msra.mxu1 %v1664_v38 }
  0x8f   : > { %1453 = vmatprep.subr.bf16.mxu0 %v1665_v39  ;;  %1481 = vmatprep.subr.bf16.mxu1 %v1666_v40 }
  0x92   : > { %1454 = vmatpush3.bf16.msra.mxu0 %v1667_v41  ;;  %1482 = vmatpush3.bf16.msra.mxu1 %v1668_v42  ;;  %v1671_v41 = vld [vmem:[%s2164_s5 + $0x10] sm:$0xff]  }
  0x93   : > { %1515 = vmatprep.subr.bf16.mxu0 %v2061_v43 }
 0x147   : > { %v496_v55 = vpop.f32.mrb[0].mxu0  ;;  %v549_v56 = vpop.f32.mrb[0].mxu1 }
 0x148   : > { %v497_v57 = vadd.f32 %v496_v55, %v418_v51  ;;  %v550_v58 = vadd.f32 %v549_v56, %v426_v52  ;;  %v498_v59 = vpop.f32.mrb[1].mxu0  ;;  %v551_v60 = vpop.f32.mrb[1].mxu1  ;;  %v1678_v55 = vld [vmem:[#allocation7 + $0x8] sm:$0xff]   ;;  %v1679_v56 = vld [vmem:[#allocation7 + $0x10] sm:$0xff]  }
 0x149   : > { %v499_v61 = vadd.f32 %v498_v59, %v422_v53  ;;  %v552_v62 = vadd.f32 %v551_v60, %v430_v54  ;;  %v500_v63 = vpop.f32.mrb[2].mxu0  ;;  %v553_v0 = vpop.f32.mrb[2].mxu1  ;;  %v1682_v59 = vld [vmem:[#allocation7 + $0x28] sm:$0xff]  }
 0x14a   : > { %v570_v1 = vmax.f32 %v550_v58, 0.0  ;;  %v501_v2 = vadd.f32 %v500_v63, %v418_v51  ;;  %v554_v3 = vadd.f32 %v553_v0, %v426_v52  ;;  %v502_v4 = vpop.f32.mrb[3].mxu0  ;;  %v555_v5 = vpop.f32.mrb[3].mxu1  ;;  %v568_v9 = vmax.f32 %v497_v57, 0.0  ;;  %v1680_v57 = vld [vmem:[#allocation7 + $0x18] sm:$0xff]   ;;  %v1681_v58 = vld [vmem:[#allocation7 + $0x20] sm:$0xff]  }
 0x14b   : > { %v571_v6 = vmax.f32 %v552_v62, 0.0  ;;  %v503_v7 = vadd.f32 %v502_v4, %v422_v53  ;;  %v556_v8 = vadd.f32 %v555_v5, %v430_v54  ;;  %v569_v12 = vmax.f32 %v499_v61, 0.0  ;;  %v1359_v62 = vld [vmem:[%s2163_s4] ss:$0 sm:$0xff] }
 0x14c   : > { %v572_v10 = vmax.f32 %v501_v2, 0.0  ;;  %v574_v11 = vmax.f32 %v554_v3, 0.0 }
 0x14d   : > { %v573_v13 = vmax.f32 %v503_v7, 0.0  ;;  %v575_v14 = vmax.f32 %v556_v8, 0.0 }
 0x14e   : > { %v584_v15 = vpack.c.bf16 %v572_v10, %v568_v9  ;;  %v586_v16 = vpack.c.bf16 %v574_v11, %v570_v1 }
 0x14f   : > { %v585_v17 = vpack.c.bf16 %v573_v13, %v569_v12  ;;  %v587_v18 = vpack.c.bf16 %v575_v14, %v571_v6  ;;  %v506_v19 = vpop.f32.mrb[4].mxu0  ;;  %v559_v20 = vpop.f32.mrb[4].mxu1 }
 0x150   : > { %v507_v21 = vadd.f32 %v506_v19, %v418_v51  ;;  %v560_v22 = vadd.f32 %v559_v20, %v426_v52  ;;  %v508_v23 = vpop.f32.mrb[5].mxu0  ;;  %v561_v24 = vpop.f32.mrb[5].mxu1 }
 0x151   : > { %v509_v26 = vadd.f32 %v508_v23, %v422_v53  ;;  %v562_v27 = vadd.f32 %v561_v24, %v430_v54  ;;  %v510_v28 = vpop.f32.mrb[6].mxu0  ;;  %v563_v29 = vpop.f32.mrb[6].mxu1  ;;  %887 = vmatprep.mubr.bf16.mxu0 %v585_v17  ;;  %936 = vmatprep.mubr.bf16.mxu1 %v587_v18 }
 0x152   : > { %v578_v30 = vmax.f32 %v560_v22, 0.0  ;;  %v511_v31 = vadd.f32 %v510_v28, %v418_v51  ;;  %v564_v32 = vadd.f32 %v563_v29, %v426_v52  ;;  %v512_v33 = vpop.f32.mrb[7].mxu0  ;;  %v565_v34 = vpop.f32.mrb[7].mxu1  ;;  %888 = vmatmul.mubr.bf16.vlgmr.msra.gmra.mrb[8].mxu0 %v584_v15  ;;  %937 = vmatmul.mubr.bf16.vlgmr.msra.gmra.mrb[8].mxu1 %v586_v16  ;;  %v576_v38 = vmax.f32 %v507_v21, 0.0  ;;  %v1674_v51 = vld [vmem:[%s2164_s5 + $0x28] sm:$0xff]   ;;  %v1675_v52 = vld [vmem:[%s2164_s5 + $0x30] sm:$0xff]  }
 0x153   : > { %v579_v35 = vmax.f32 %v562_v27, 0.0  ;;  %v513_v36 = vadd.f32 %v512_v33, %v422_v53  ;;  %v566_v37 = vadd.f32 %v565_v34, %v430_v54  ;;  %1516 = vmatpush3.bf16.msra.mxu0 %v2061_v43  ;;  %v577_v42 = vmax.f32 %v509_v26, 0.0  ;;  %v1672_v43 = vld [vmem:[%s2164_s5 + $0x18] sm:$0xff]  }
 0x154   : > { %v580_v39 = vmax.f32 %v511_v31, 0.0  ;;  %v582_v40 = vmax.f32 %v564_v32, 0.0  ;;  %1517 = vmatprep.subr.bf16.mxu0 %v1670_v25  ;;  %v1676_v53 = vld [vmem:[%s2164_s5 + $0x38] sm:$0xff]  }
 0x155   : > { %v581_v44 = vmax.f32 %v513_v36, 0.0  ;;  %v583_v45 = vmax.f32 %v566_v37, 0.0  ;;  %v1677_v54 = vld [vmem:[#allocation7] sm:$0xff]   ;;  %v1684_v36 = vld [vmem:[#allocation7 + $0x38] sm:$0xff]   ;;  %v1392_v37 = vld [vmem:[%s2165_s6] ss:$0 sm:$0xff] }
 0x156   : > { %v588_v46 = vpack.c.bf16 %v580_v39, %v576_v38  ;;  %v590_v47 = vpack.c.bf16 %v582_v40, %v578_v30  ;;  %1535 = vmatprep.subr.bf16.mxu1 %v1677_v54 }
 0x157   : > { %v589_v48 = vpack.c.bf16 %v581_v44, %v577_v42  ;;  %v591_v49 = vpack.c.bf16 %v583_v45, %v579_v35  ;;  %1518 = vmatpush3.bf16.msra.mxu0 %v1670_v25  ;;  %1536 = vmatpush3.bf16.msra.mxu1 %v1677_v54  ;;  %v1683_v35 = vld [vmem:[#allocation7 + $0x30] sm:$0xff]  }
 0x158   : > { %1519 = vmatprep.subr.bf16.mxu0 %v1671_v41  ;;  %1537 = vmatprep.subr.bf16.mxu1 %v1678_v55 }
 0x159   : > { %895 = vmatprep.mubr.bf16.mxu0 %v589_v48  ;;  %944 = vmatprep.mubr.bf16.mxu1 %v591_v49 }
 0x15a   : > { %896 = vmatmul.mubr.bf16.gmra.mrb[12].mxu0 %v588_v46  ;;  %945 = vmatmul.mubr.bf16.gmra.mrb[12].mxu1 %v590_v47 }
 0x15b   : > { %1520 = vmatpush3.bf16.msra.mxu0 %v1671_v41  ;;  %1538 = vmatpush3.bf16.msra.mxu1 %v1678_v55 }
 0x15c   : > { %1521 = vmatprep.subr.bf16.mxu0 %v1672_v43  ;;  %1539 = vmatprep.subr.bf16.mxu1 %v1679_v56 }
 0x15f   : > { %1522 = vmatpush3.bf16.msra.mxu0 %v1672_v43  ;;  %1540 = vmatpush3.bf16.msra.mxu1 %v1679_v56 }
 0x160   : > { %1523 = vmatprep.subr.bf16.mxu0 %v1673_v50  ;;  %1541 = vmatprep.subr.bf16.mxu1 %v1680_v57 }
 0x163   : > { %1524 = vmatpush3.bf16.msra.mxu0 %v1673_v50  ;;  %1542 = vmatpush3.bf16.msra.mxu1 %v1680_v57 }
 0x164   : > { %1525 = vmatprep.subr.bf16.mxu0 %v1674_v51  ;;  %1543 = vmatprep.subr.bf16.mxu1 %v1681_v58 }
 0x167   : > { %1526 = vmatpush3.bf16.msra.mxu0 %v1674_v51  ;;  %1544 = vmatpush3.bf16.msra.mxu1 %v1681_v58 }
 0x168   : > { %1527 = vmatprep.subr.bf16.mxu0 %v1675_v52  ;;  %1545 = vmatprep.subr.bf16.mxu1 %v1682_v59 }
 0x16b   : > { %1528 = vmatpush3.bf16.msra.mxu0 %v1675_v52  ;;  %1546 = vmatpush3.bf16.msra.mxu1 %v1682_v59 }
 0x16c   : > { %1529 = vmatprep.subr.bf16.mxu0 %v1676_v53  ;;  %1547 = vmatprep.subr.bf16.mxu1 %v1683_v35 }
 0x16f   : > { %1530 = vmatpush3.bf16.msra.mxu0 %v1676_v53  ;;  %1548 = vmatpush3.bf16.msra.mxu1 %v1683_v35  ;;  %v1401_v53 = vld [vmem:[%s2167_s8] ss:$0 sm:$0xff] }
 0x170   : > { %1549 = vmatprep.subr.bf16.mxu1 %v1684_v36 }
 0x173   : > { %1550 = vmatpush3.bf16.msra.mxu1 %v1684_v36 }
 0x225   : > { %v1455_v60 = vpop.f32.mrb[8].mxu0  ;;  %v1483_v61 = vpop.f32.mrb[8].mxu1 }
 0x226   : > { %v1456_v63 = vpop.f32.mrb[9].mxu0  ;;  %v1484_v0 = vpop.f32.mrb[9].mxu1 }
 0x227   : > { %v1457_v1 = vadd.f32 %v1456_v63, %v1455_v60  ;;  %v1485_v2 = vadd.f32 %v1484_v0, %v1483_v61  ;;  %v1458_v3 = vpop.f32.mrb[10].mxu0  ;;  %v1486_v4 = vpop.f32.mrb[10].mxu1 }
 0x228   : > { %v1459_v5 = vpop.f32.mrb[11].mxu0  ;;  %v1487_v6 = vpop.f32.mrb[11].mxu1 }
 0x229   : > { %v890_v7 = vadd.f32 %v1457_v1, %v1359_v62  ;;  %v1460_v8 = vadd.f32 %v1459_v5, %v1458_v3  ;;  %v1488_v9 = vadd.f32 %v1487_v6, %v1486_v4 }
 0x22b   : > { %v939_v10 = vadd.f32 %v1485_v2, %v890_v7  ;;  %v893_v11 = vadd.f32 %v1460_v8, %v1359_v62 }
 0x22d   : > { %v942_v12 = vadd.f32 %v1488_v9, %v893_v11  ;;  %v1461_v13 = vpop.f32.mrb[12].mxu0  ;;  %v1489_v14 = vpop.f32.mrb[12].mxu1  ;;  %v953_v17 = vmax.f32 %v939_v10, 0.0 }
 0x22e   : > { %v1462_v15 = vpop.f32.mrb[13].mxu0  ;;  %v1490_v16 = vpop.f32.mrb[13].mxu1 }
 0x22f   : > { %v954_v18 = vmax.f32 %v942_v12, 0.0  ;;  %v1463_v19 = vadd.f32 %v1462_v15, %v1461_v13  ;;  %v1491_v20 = vadd.f32 %v1490_v16, %v1489_v14  ;;  %v1464_v21 = vpop.f32.mrb[14].mxu0  ;;  %v1492_v22 = vpop.f32.mrb[14].mxu1 }
 0x230   : > { %v1465_v23 = vpop.f32.mrb[15].mxu0  ;;  %v1493_v24 = vpop.f32.mrb[15].mxu1 }
 0x231   : > { %v898_v25 = vadd.f32 %v1463_v19, %v1359_v62  ;;  %v1466_v26 = vadd.f32 %v1465_v23, %v1464_v21  ;;  %v1494_v27 = vadd.f32 %v1493_v24, %v1492_v22  ;;  %v957_v28 = vpack.c.bf16 %v954_v18, %v953_v17 }
 0x233   : > { %v947_v29 = vadd.f32 %v1491_v20, %v898_v25  ;;  %v901_v30 = vadd.f32 %v1466_v26, %v1359_v62  ;;  %1531 = vmatprep.mubr.bf16.mxu0 %v957_v28 }
 0x235   : > { %v950_v31 = vadd.f32 %v1494_v27, %v901_v30  ;;  %v955_v32 = vmax.f32 %v947_v29, 0.0 }
 0x237   : > { %v956_v33 = vmax.f32 %v950_v31, 0.0 }
 0x239   : > { %v958_v34 = vpack.c.bf16 %v956_v33, %v955_v32 }
 0x23b   : > { %1532 = vmatmul.mubr.bf16.vlgmr.msra.gmra.mrb[16].mxu0 %v958_v34 }
 0x30e   : > { %v1533_v38 = vpop.f32.mrb[16].mxu0 }
 0x30f   : > { %v1073_v39 = vadd.f32 %v1533_v38, %v1392_v37  ;;  %v1064_v40 = vpop.f32.mrb[17].mxu0 }
 0x310   : > { %v1065_v41 = vadd.f32 %v1392_v37, %v1064_v40  ;;  %v1534_v42 = vpop.f32.mrb[18].mxu0 }
 0x311   : > { %v1076_v44 = vadd.f32 %v1534_v42, %v1392_v37  ;;  %v1067_v45 = vpop.f32.mrb[19].mxu0  ;;  %v1081_v47 = vmax.f32 %v1073_v39, 0.0 }
 0x312   : > { %v1068_v46 = vadd.f32 %v1392_v37, %v1067_v45  ;;  %v1079_v49 = vmax.f32 %v1065_v41, 0.0 }
 0x313   : > { %v1082_v48 = vmax.f32 %v1076_v44, 0.0 }
 0x314   : > { %v1080_v43 = vmax.f32 %v1068_v46, 0.0 }
 0x315   : > { %v1084_v50 = vpack.c.bf16 %v1082_v48, %v1081_v47 }
 0x316   : > { %v1083_v51 = vpack.c.bf16 %v1080_v43, %v1079_v49 }
 0x318   : > { %1551 = vmatprep.mubr.bf16.mxu1 %v1083_v51 }
 0x319   : > { %1552 = vmatmul.mubr.bf16.vlgmr.msra.gmra.mrb[16].mxu1 %v1084_v50 }
 0x3ec   : > { %v1553_v52 = vpop.f32.mrb[16].mxu1 }
 0x3ed   : > { %v1190_v54 = vpop.f32.mrb[17].mxu1  ;;  %v1199_v56 = vadd.f32 %v1553_v52, %v1401_v53 }
 0x3ee   : > { %v1554_v55 = vpop.f32.mrb[18].mxu1  ;;  %v1191_v59 = vadd.f32 %v1401_v53, %v1190_v54  ;;  %1232 = sbr.rel (!%p2195_p13) target bundleno = 1041 (0x411), region = 72 }
 0x3ef   : > { %v1202_v57 = vadd.f32 %v1554_v55, %v1401_v53  ;;  %v1193_v58 = vpop.f32.mrb[19].mxu1 }
 0x3f0   : > { %v1194_v60 = vadd.f32 %v1401_v53, %v1193_v58 }
 0x3f1   : > { %v1436_v61 = vpack.c.bf16 %v1202_v57, %v1199_v56 }
 0x3f2   : > { %v1431_v62 = vpack.c.bf16 %v1194_v60, %v1191_v59 }
 0x3f3   : > { %1438 = vst [vmem:[%s382_s14 + $0x8] sm:$0xff] %v1436_v61  }
 0x3f4   : > { %1432 = vst [vmem:[%s382_s14] sm:$0xff] %v1431_v62  }
 0x3f5   : > { %s2204_s17 = smov (!%p1235_p1, %s1234_s17), 4 }
 0x3f6   : > { %s2104_s15 = sshll.u32 %s2204_s17, 6 }
 0x3f7   : > { %s1239_s18 = ssub.s32 256, %s2104_s15 }
 0x3f8   : > { %1240 = vsyncadd %s2099_s21, %s1239_s18  ;;  %p1417_p2 = scmp.ne.s32.totalorder %s2104_s15, 0  ;;  %s1427_s20 = sshll.u32 %s1923_s13, 8 }
 0x3f9   : > { %s2113_s19 = scalar_lea.hbm %s2168_s9, %s1427_s20  ;;  %s1245_s22 = sshll.u32 %s382_s14, 4  ;;  %s2115_s22 = int_to_ptr.vmem [resolvable:$true] %s1245_s22 }
 0x3fa   : > { %s1769_s24 = scalar_lea.vmem %s2115_s22, %s2104_s15  ;;  %s1849_s25 = smov [#allocation8]  }
 0x3fb   : > { %p1770_p3 = scmp.ne.s32.totalorder %s2115_s22, %s1769_s24  ;;  %s1773_s27 = sshll.u32 %s1849_s25, 4  ;;  %s1774_s27 = int_to_ptr.vmem [resolvable:$false] %s1773_s27 }
 0x3fc   : > { %s1775_s13 = scalar_lea.vmem %s1774_s27, 512  ;;  %p1776_p8 = scmp.lt.s32.totalorder %s2115_s22, %s1774_s27 }
 0x3fd   : > { %p1771_p4 = pnand %p1770_p3, %p1417_p2  ;;  %p1777_p11 = scmp.lt.s32.totalorder %s1775_s13, %s1769_s24 }
 0x3ff   : > { %p1772_p7 = pneg %p1771_p4  ;;  %p1778_p5 = por %p1777_p11, %p1776_p8 }
 0x401   : > { %p1779_p0 = pnand %p1778_p5, %p1772_p7 }
 0x403   : > { %1782 = shalt.err (!%p1779_p0)
}
 0x404   : > { %s1783_s23 = scalar_lea.hbm %s2113_s19, %s2104_s15  ;;  %s1787_s11 = scalar_lea.hbm %s2168_s9, 448 }
 0x405   : > { %p1784_p6 = scmp.ne.s32.totalorder %s2113_s19, %s1783_s23  ;;  %p1788_p12 = scmp.lt.u32.totalorder %s2113_s19, %s2168_s9 }
 0x406   : > { %p1789_p13 = scmp.lt.u32.totalorder %s1787_s11, %s1783_s23  ;;  %p1791_p3 = scmp.lt.u32.totalorder %s1783_s23, %s2113_s19 }
 0x407   : > { %p1785_p9 = pnand %p1784_p6, %p1417_p2 }
 0x408   : > { %p1790_p1 = por %p1789_p13, %p1788_p12 }
 0x409   : > { %p1786_p10 = pneg %p1785_p9 }
 0x40a   : > { %p1792_p4 = por %p1791_p3, %p1790_p1 }
 0x40c   : > { %p1793_p7 = pnand %p1792_p4, %p1786_p10 }
 0x40e   : > { %1796 = shalt.err (!%p1793_p7)
}
 0x40f   : > { %s1850_s17 = smov 64   ;;  %s1851_s18 = smov 4  }
 0x410   : > { %1251 = dma.vmem_to_hbm [thread:$0]  (%p1417_p2), %s2115_s22, %s2104_s15, %s2113_s19, %s2099_s21, %s1850_s17, %s1850_s17, %s1851_s18  }
 0x411 PF: > { %s2196_s20 = sld [smem:[#allocation15_spill]]  ;;  %p1588_p8 = scmp.ge.s32.totalorder %s1839_s12, 2 }
 0x412   : > { %s1260_s29 = sand.u32 1, %s1827_s30  }
 0x413   : > { %s1261_s16 = scalar_lea.sflag [#allocation4], %s1260_s29 }
 0x417   : > { %p2197_p11 = scmp.ne.s32.totalorder %s2196_s20, 0 }
 0x419   : > { %p1579_p5 = pnand %p1588_p8, %p2197_p11 }
 0x41b   : > { %1822 = dma.done.wait (!%p1579_p5), %s1261_s16, 256  }
 0x41c   : > { %1824 = vsyncadd (!%p1579_p5), %s1261_s16, 4294967040  ;;  %s2198_s12 = sld [smem:[#allocation13_spill]]  ;;  %s2199_s24 = sld [smem:[#allocation12_spill]] }
 0x41d   : > { %s2200_s11 = sld [smem:[#allocation14_spill]]  ;;  %s2201_s30 = smov %s1831_s10 }
 0x422   : > { %p21_p0 = scmp.ge.s32.totalorder %s2198_s12, 4   ;;  %s2202_s10 = smov %s2199_s24 }
 0x424   :  { %23 = sbr.rel (!%p21_p0) target bundleno = 7 (0x7), region = 104 }
 0x42b   :  { %1266 = vsyncpa [#allocation3], 1 }
 0x42c   :  { %1268 = vsyncpa [#allocation3 + $0x1], 1 }
 0x42d   :  { %1269 = vsyncpa [#allocation6], 1 }
 0x42e   :  { %1270 = vsyncpa [#allocation4], 1 }
 0x42f   :  { %1272 = vsyncpa [#allocation4 + $0x1], 1 }

</bundles_post_ra>
